<compile_context>
chip_gen: v7x
topology: tpu7x:2x2x1
jax: 0.10.0
libtpu: 0.0.40
codegen_flags: <defaults>
</compile_context>

<pallas_src>
import jax
import jax.numpy as jnp
from jax.experimental import pallas as pl
from jax.experimental.pallas import tpu as pltpu


def _round_up(x, m):
    return ((x + m - 1) // m) * m


def _pad_axis(x, axis, target):
    pad = target - x.shape[axis]
    if pad == 0:
        return x
    widths = [(0, 0)] * x.ndim
    widths[axis] = (0, pad)
    return jnp.pad(x, widths)


def _pick_batch_tile(B, L_out, L_in_p, H_p, itemsize,
                     target_rows=256, vmem_budget=8 << 20):
    """Largest divisor of B whose per-step (double-buffered) blocks stay small."""
    best = 1
    for cand in range(2, B + 1):
        if B % cand:
            continue
        if cand * L_out > target_rows:
            continue
        blk_bytes = 2 * itemsize * cand * (
            L_in_p * H_p + 2 * L_out * H_p + L_out * L_in_p)
        if blk_bytes > vmem_budget:
            continue
        best = cand
    return best


def _make_kernel(L_in, L_in_p, H_p, Bt, L_out, matmul_dtype, return_attn):
    def kernel(enc_ref, dec_ref, wc_ref, wd_ref, b_ref, out_ref, *attn_refs):
        enc = enc_ref[...]                        # (Bt, L_in_p, H_p) f32
        dec = dec_ref[...]                        # (Bt, L_out, H_p)  f32
        enc_mm = enc.astype(matmul_dtype)
        dec_mm = dec.astype(matmul_dtype)

        # scores[b, q, k] = sum_d dec[b, q, d] * enc[b, k, d]   (no transpose)
        scores = jax.lax.dot_general(
            dec_mm, enc_mm,
            dimension_numbers=(((2,), (2,)), ((0,), (0,))),
            preferred_element_type=jnp.float32)   # (Bt, L_out, L_in_p)

        if L_in_p != L_in:
            key_idx = jax.lax.broadcasted_iota(jnp.int32, scores.shape, 2)
            scores = jnp.where(key_idx < L_in, scores, -1e30)

        m = jnp.max(scores, axis=-1, keepdims=True)
        e = jnp.exp(scores - m)
        denom = jnp.sum(e, axis=-1, keepdims=True)
        attn = e * pl.reciprocal(denom, approx=True)   # f32, (Bt, L_out, L_in_p)

        if return_attn:
            attn_refs[0][...] = attn.astype(attn_refs[0].dtype)

        # ctx[b, q, d] = sum_k attn[b, q, k] * enc[b, k, d]
        ctx = jax.lax.dot_general(
            attn.astype(matmul_dtype), enc_mm,
            dimension_numbers=(((2,), (1,)), ((0,), (0,))),
            preferred_element_type=jnp.float32)   # (Bt, L_out, H_p)

        # Shared projection: flatten batch rows into one (Bt*L_out, H_p) matmul
        # per weight half so the MXU sees a larger M.
        rows = Bt * L_out
        ctx2 = ctx.reshape(rows, H_p).astype(matmul_dtype)
        dec2 = dec_mm.reshape(rows, H_p)
        pre = (jnp.dot(ctx2, wc_ref[...], preferred_element_type=jnp.float32)
               + jnp.dot(dec2, wd_ref[...], preferred_element_type=jnp.float32)
               + b_ref[...])
        out_ref[...] = jnp.tanh(pre).reshape(Bt, L_out, H_p).astype(out_ref.dtype)

    return kernel


def attention_pallas(encoder_output, decoder_output, w, b, *,
                     matmul_dtype=jnp.float32, return_attn=True,
                     lane_multiple=128):
    """encoder_output: (B, L_in, H); decoder_output: (B, L_out, H)
       w: (H, 2H) nn.Linear weight (out_features, in_features); b: (H,)."""
    B, L_in, H = encoder_output.shape
    _, L_out, _ = decoder_output.shape
    out_dtype = encoder_output.dtype

    H_p = _round_up(H, lane_multiple)
    L_in_p = _round_up(L_in, lane_multiple)

    # Lane-pad activations (zero padding on H is exact for the contractions;
    # padded keys are masked inside the kernel before the softmax).
    enc_p = _pad_axis(_pad_axis(encoder_output, 2, H_p), 1, L_in_p)
    dec_p = _pad_axis(decoder_output, 2, H_p)

    # Split W^T into the half multiplying context and the half for decoder,
    # pad to (H_p, H_p) and cast once to the MXU operand dtype.
    wt = w.T                                     # (2H, H)
    w_ctx = _pad_axis(_pad_axis(wt[:H, :], 1, H_p), 0, H_p).astype(matmul_dtype)
    w_dec = _pad_axis(_pad_axis(wt[H:, :], 1, H_p), 0, H_p).astype(matmul_dtype)
    b_p = _pad_axis(b.reshape(1, H), 1, H_p).astype(jnp.float32)

    Bt = _pick_batch_tile(B, L_out, L_in_p, H_p, jnp.dtype(out_dtype).itemsize)
    num_blocks = B // Bt

    kernel = _make_kernel(L_in, L_in_p, H_p, Bt, L_out, matmul_dtype, return_attn)

    out_shape = [jax.ShapeDtypeStruct((B, L_out, H_p), out_dtype)]
    out_specs = [pl.BlockSpec((Bt, L_out, H_p), lambda i: (i, 0, 0))]
    if return_attn:
        out_shape.append(jax.ShapeDtypeStruct((B, L_out, L_in_p), out_dtype))
        out_specs.append(pl.BlockSpec((Bt, L_out, L_in_p), lambda i: (i, 0, 0)))

    results = pl.pallas_call(
        kernel,
        out_shape=tuple(out_shape),
        grid=(num_blocks,),
        in_specs=[
            pl.BlockSpec((Bt, L_in_p, H_p), lambda i: (i, 0, 0)),
            pl.BlockSpec((Bt, L_out, H_p), lambda i: (i, 0, 0)),
            pl.BlockSpec((H_p, H_p), lambda i: (0, 0)),   # resident weights
            pl.BlockSpec((H_p, H_p), lambda i: (0, 0)),
            pl.BlockSpec((1, H_p), lambda i: (0, 0)),
        ],
        out_specs=tuple(out_specs),
        compiler_params=pltpu.CompilerParams(
            dimension_semantics=("parallel",)),
    )(enc_p, dec_p, w_ctx, w_dec, b_p)

    out = results[0][:, :, :H]
    if return_attn:
        return out, results[1][:, :, :L_in]
    return out


def attention_reference(encoder_output, decoder_output, w, b):
    scores = jnp.einsum("bqh,bkh->bqk", decoder_output, encoder_output)
    attn = jax.nn.softmax(scores, axis=2)
    ctx = jnp.einsum("bqk,bkh->bqh", attn, encoder_output)
    cat = jnp.concatenate([ctx, decoder_output], axis=2)
    out = jnp.tanh(jnp.einsum("bqi,oi->bqo", cat, w) + b)
    return out, attn


if __name__ == "__main__":
    # Small shapes consistent with the module's forward.
    B, L_in, L_out, H = 2, 16, 8, 32

    key = jax.random.PRNGKey(0)
    k_enc, k_dec, k_w, k_b = jax.random.split(key, 4)

    encoder_output = jax.random.normal(k_enc, (B, L_in, H), dtype=jnp.float32)
    decoder_output = jax.random.normal(k_dec, (B, L_out, H), dtype=jnp.float32)

    # nn.Linear(2H, H): weight (H, 2H), bias (H,) — deterministic init.
    bound = 1.0 / jnp.sqrt(2.0 * H)
    w = jax.random.uniform(k_w, (H, 2 * H), jnp.float32, -bound, bound)
    b = jax.random.uniform(k_b, (H,), jnp.float32, -bound, bound)

    out_ref, attn_ref = attention_reference(encoder_output, decoder_output, w, b)

    # f32 MXU operand path (exact up to the EUP approx reciprocal).
    out, attn = attention_pallas(encoder_output, decoder_output, w, b,
                                 matmul_dtype=jnp.float32)
    out, attn = jax.block_until_ready((out, attn))
    assert out.shape == (B, L_out, H) and attn.shape == (B, L_out, L_in)
    assert jnp.allclose(out, out_ref, atol=5e-3, rtol=5e-3)
    assert jnp.allclose(attn, attn_ref, atol=5e-3, rtol=5e-3)

    # bf16 MXU operand path (f32 accumulation) — the v6e/v7x fast path.
    out16, attn16 = attention_pallas(encoder_output, decoder_output, w, b,
                                     matmul_dtype=jnp.bfloat16)
    out16, attn16 = jax.block_until_ready((out16, attn16))
    assert jnp.allclose(out16, out_ref, atol=1e-1, rtol=1e-1)
    assert jnp.allclose(attn16, attn_ref, atol=1e-1, rtol=1e-1)

    print("KERNEL_OK")
</pallas_src>

<mosaic_0001>
module attributes {stable_mosaic.version = 11 : i64} {
  func.func @kernel(%arg0: i32, %arg1: memref<2x128x128xf32, #tpu.memory_space<vmem>>, %arg2: memref<2x8x128xf32, #tpu.memory_space<vmem>>, %arg3: memref<128x128xf32, #tpu.memory_space<vmem>>, %arg4: memref<128x128xf32, #tpu.memory_space<vmem>>, %arg5: memref<1x128xf32, #tpu.memory_space<vmem>>, %arg6: memref<2x8x128xf32, #tpu.memory_space<vmem>>, %arg7: memref<2x8x128xf32, #tpu.memory_space<vmem>>) attributes {dimension_semantics = [#tpu.dimension_semantics<parallel>], iteration_bounds = array<i64: 1>, scalar_prefetch = 0 : i64, scratch_operands = 0 : i64, tpu.core_type = #tpu.core_type<tc>, window_params = [{transform_indices = @transform_0, window_bounds = array<i64: 2, 128, 128>}, {transform_indices = @transform_1, window_bounds = array<i64: 2, 8, 128>}, {pipeline_mode = #tpu.pipeline_mode<synchronous>, transform_indices = @transform_2, window_bounds = array<i64: 128, 128>}, {pipeline_mode = #tpu.pipeline_mode<synchronous>, transform_indices = @transform_3, window_bounds = array<i64: 128, 128>}, {pipeline_mode = #tpu.pipeline_mode<synchronous>, transform_indices = @transform_4, window_bounds = array<i64: 1, 128>}, {transform_indices = @transform_5, window_bounds = array<i64: 2, 8, 128>}, {transform_indices = @transform_6, window_bounds = array<i64: 2, 8, 128>}]} {
    %c0 = arith.constant 0 : index
    %c0_0 = arith.constant 0 : index
    %c0_1 = arith.constant 0 : index
    %0 = vector.load %arg1[%c0, %c0_0, %c0_1] : memref<2x128x128xf32, #tpu.memory_space<vmem>>, vector<2x128x128xf32>
    %c0_2 = arith.constant 0 : index
    %c0_3 = arith.constant 0 : index
    %c0_4 = arith.constant 0 : index
    %1 = vector.load %arg2[%c0_2, %c0_3, %c0_4] : memref<2x8x128xf32, #tpu.memory_space<vmem>>, vector<2x8x128xf32>
    %cst = arith.constant dense<0.000000e+00> : vector<2x8x128xf32>
    %2 = tpu.matmul %1, %0, %cst {dimension_numbers = #tpu.dot_dimension_numbers<[2], [2], [1], [1], [0, 0, 0, 1, 1, 1], [0], [0]>} : vector<2x8x128xf32>, vector<2x128x128xf32>, vector<2x8x128xf32> -> vector<2x8x128xf32>
    %3 = tpu.iota {dimensions = array<i32: 2>} : vector<2x8x128xi32>
    %c16_i32 = arith.constant 16 : i32
    %4 = vector.broadcast %c16_i32 : i32 to vector<2x8x128xi32>
    %5 = arith.cmpi slt, %3, %4 : vector<2x8x128xi32>
    %cst_5 = arith.constant -1.000000e+30 : f32
    %6 = vector.broadcast %cst_5 : f32 to vector<2x8x128xf32>
    %7 = arith.select %5, %2, %6 : vector<2x8x128xi1>, vector<2x8x128xf32>
    %cst_6 = arith.constant dense<0xFF800000> : vector<2x8xf32>
    %8 = vector.multi_reduction <maximumf>, %7, %cst_6 [2] : vector<2x8x128xf32> to vector<2x8xf32>
    %9 = vector.shape_cast %8 : vector<2x8xf32> to vector<2x8x1xf32>
    %10 = vector.broadcast %9 : vector<2x8x1xf32> to vector<2x8x128xf32>
    %11 = arith.subf %7, %10 : vector<2x8x128xf32>
    %12 = math.exp %11 : vector<2x8x128xf32>
    %cst_7 = arith.constant dense<0.000000e+00> : vector<2x8xf32>
    %13 = vector.multi_reduction <add>, %12, %cst_7 [2] : vector<2x8x128xf32> to vector<2x8xf32>
    %14 = vector.shape_cast %13 : vector<2x8xf32> to vector<2x8x1xf32>
    %15 = tpu.reciprocal %14 {approx = true} : vector<2x8x1xf32> -> vector<2x8x1xf32>
    %16 = vector.broadcast %15 : vector<2x8x1xf32> to vector<2x8x128xf32>
    %17 = arith.mulf %12, %16 : vector<2x8x128xf32>
    %c0_8 = arith.constant 0 : index
    %c0_9 = arith.constant 0 : index
    %c0_10 = arith.constant 0 : index
    %18 = vector.load %arg7[%c0_8, %c0_9, %c0_10] : memref<2x8x128xf32, #tpu.memory_space<vmem>>, vector<2x8x128xf32>
    tpu.vector_store %arg7[%c0_8, %c0_9, %c0_10], %17 {strides = array<i32>} : memref<2x8x128xf32, #tpu.memory_space<vmem>>, vector<2x8x128xf32>,
    %cst_11 = arith.constant dense<0.000000e+00> : vector<2x8x128xf32>
    %19 = tpu.matmul %17, %0, %cst_11 {dimension_numbers = #tpu.dot_dimension_numbers<[2], [1], [1], [2], [0, 0, 0, 1, 1, 2], [0], [0]>} : vector<2x8x128xf32>, vector<2x128x128xf32>, vector<2x8x128xf32> -> vector<2x8x128xf32>
    %20 = vector.shape_cast %19 : vector<2x8x128xf32> to vector<16x128xf32>
    %21 = vector.shape_cast %1 : vector<2x8x128xf32> to vector<16x128xf32>
    %c0_12 = arith.constant 0 : index
    %c0_13 = arith.constant 0 : index
    %22 = vector.load %arg3[%c0_12, %c0_13] : memref<128x128xf32, #tpu.memory_space<vmem>>, vector<128x128xf32>
    %cst_14 = arith.constant dense<0.000000e+00> : vector<16x128xf32>
    %23 = tpu.matmul %20, %22, %cst_14 {dimension_numbers = #tpu.dot_dimension_numbers<[1], [0], [0], [1], [0, 0, 1, 1], [], []>} : vector<16x128xf32>, vector<128x128xf32>, vector<16x128xf32> -> vector<16x128xf32>
    %c0_15 = arith.constant 0 : index
    %c0_16 = arith.constant 0 : index
    %24 = vector.load %arg4[%c0_15, %c0_16] : memref<128x128xf32, #tpu.memory_space<vmem>>, vector<128x128xf32>
    %cst_17 = arith.constant dense<0.000000e+00> : vector<16x128xf32>
    %25 = tpu.matmul %21, %24, %cst_17 {dimension_numbers = #tpu.dot_dimension_numbers<[1], [0], [0], [1], [0, 0, 1, 1], [], []>} : vector<16x128xf32>, vector<128x128xf32>, vector<16x128xf32> -> vector<16x128xf32>
    %26 = arith.addf %23, %25 : vector<16x128xf32>
    %c0_18 = arith.constant 0 : index
    %c0_19 = arith.constant 0 : index
    %27 = vector.load %arg5[%c0_18, %c0_19] : memref<1x128xf32, #tpu.memory_space<vmem>>, vector<1x128xf32>
    %28 = vector.broadcast %27 : vector<1x128xf32> to vector<16x128xf32>
    %29 = arith.addf %26, %28 : vector<16x128xf32>
    %30 = math.tanh %29 : vector<16x128xf32>
    %31 = vector.shape_cast %30 : vector<16x128xf32> to vector<2x8x128xf32>
    %c0_20 = arith.constant 0 : index
    %c0_21 = arith.constant 0 : index
    %c0_22 = arith.constant 0 : index
    %32 = vector.load %arg6[%c0_20, %c0_21, %c0_22] : memref<2x8x128xf32, #tpu.memory_space<vmem>>, vector<2x8x128xf32>
    tpu.vector_store %arg6[%c0_20, %c0_21, %c0_22], %31 {strides = array<i32>} : memref<2x8x128xf32, #tpu.memory_space<vmem>>, vector<2x8x128xf32>,
    return
  }
  func.func @transform_0(%arg0: i32) -> (i32, i32, i32) {
    %c0_i32 = arith.constant 0 : i32
    %c0_i32_0 = arith.constant 0 : i32
    %c0_i32_1 = arith.constant 0 : i32
    return %arg0, %c0_i32, %c0_i32_0 : i32, i32, i32
  }
  func.func @transform_1(%arg0: i32) -> (i32, i32, i32) {
    %c0_i32 = arith.constant 0 : i32
    %c0_i32_0 = arith.constant 0 : i32
    %c0_i32_1 = arith.constant 0 : i32
    return %arg0, %c0_i32, %c0_i32_0 : i32, i32, i32
  }
  func.func @transform_2(%arg0: i32) -> (i32, i32) {
    %c0_i32 = arith.constant 0 : i32
    %c0_i32_0 = arith.constant 0 : i32
    %c0_i32_1 = arith.constant 0 : i32
    return %c0_i32, %c0_i32_0 : i32, i32
  }
  func.func @transform_3(%arg0: i32) -> (i32, i32) {
    %c0_i32 = arith.constant 0 : i32
    %c0_i32_0 = arith.constant 0 : i32
    %c0_i32_1 = arith.constant 0 : i32
    return %c0_i32, %c0_i32_0 : i32, i32
  }
  func.func @transform_4(%arg0: i32) -> (i32, i32) {
    %c0_i32 = arith.constant 0 : i32
    %c0_i32_0 = arith.constant 0 : i32
    %c0_i32_1 = arith.constant 0 : i32
    return %c0_i32, %c0_i32_0 : i32, i32
  }
  func.func @transform_5(%arg0: i32) -> (i32, i32, i32) {
    %c0_i32 = arith.constant 0 : i32
    %c0_i32_0 = arith.constant 0 : i32
    %c0_i32_1 = arith.constant 0 : i32
    return %arg0, %c0_i32, %c0_i32_0 : i32, i32, i32
  }
  func.func @transform_6(%arg0: i32) -> (i32, i32, i32) {
    %c0_i32 = arith.constant 0 : i32
    %c0_i32_0 = arith.constant 0 : i32
    %c0_i32_1 = arith.constant 0 : i32
    return %arg0, %c0_i32, %c0_i32_0 : i32, i32, i32
  }
}

</mosaic_0001>

<bundles_post_ra>
// kernel: tpu_custom_call.1
= control target key start
LH: loop header
LB: loop body
LE: loop exit
PB: predicated region body
PF: predicated region fallthrough
CT: control target
= control target key end

     0   :  { %12 = vsyncpa [#allocation3], 0  ;;  %s1531_s0 = inlined_call_operand.hbm [shape: f32[2,128,128], index: 0, kind: input, shape index: {}]   ;;  %s1532_s1 = inlined_call_operand.hbm [shape: f32[2,8,128], index: 1, kind: input, shape index: {}]   ;;  %s1533_s2 = inlined_call_operand.hbm [shape: f32[128,128], index: 2, kind: input, shape index: {}]   ;;  %s1534_s3 = inlined_call_operand.hbm [shape: f32[128,128], index: 3, kind: input, shape index: {}]   ;;  %s1535_s4 = inlined_call_operand.vmem [shape: f32[1,128], index: 4, kind: input, shape index: {}]   ;;  %s1536_s5 = inlined_call_operand.hbm [shape: f32[2,8,128], index: 5, kind: output, shape index: {0}]   ;;  %s1537_s6 = inlined_call_operand.hbm [shape: f32[2,8,128], index: 6, kind: output, shape index: {1}]  }
   0x1   :  { %13 = vsyncpa [#allocation6], 0 }
   0x2   :  { %14 = vsyncpa [#allocation9], 0 }
   0x3   :  { %15 = vsyncpa [#allocation4], 0 }
   0x4   :  { %16 = vsyncpa [#allocation12], 0  ;;  %s1290_s21 = smov [#allocation5]   ;;  %s1291_s23 = smov [#allocation2]  }
   0x5   :  { %s34_s22 = sshll.u32 %s1290_s21, 4  ;;  %s22_s24 = sshll.u32 %s1291_s23, 4  ;;  %s35_s22 = int_to_ptr.vmem [resolvable:$true] %s34_s22  ;;  %s1336_s24 = int_to_ptr.vmem [resolvable:$true] %s22_s24 }
   0x6   :  { %s1148_s27 = scalar_lea.hbm %s1532_s1, 256 }
   0x7   :  { %p1149_p0 = scmp.ne.s32.totalorder %s1532_s1, %s1148_s27  ;;  %p1152_p1 = scmp.lt.u32.totalorder %s1148_s27, %s1532_s1 }
   0x9   :  { %p1154_p2 = pnand %p1152_p1, %p1149_p0 }
   0xb   :  { %1157 = shalt.err (!%p1154_p2)
}
   0xc   :  { %s1158_s8 = scalar_lea.vmem %s35_s22, 256  ;;  %p1163_p4 = scmp.lt.s32.totalorder %s35_s22, %s35_s22 }
   0xd   :  { %p1159_p3 = scmp.ne.s32.totalorder %s35_s22, %s1158_s8  ;;  %p1164_p5 = scmp.lt.s32.totalorder %s1158_s8, %s1158_s8 }
   0xf   :  { %p1165_p6 = por %p1164_p5, %p1163_p4 }
  0x11   :  { %p1166_p7 = pnand %p1165_p6, %p1159_p3 }
  0x13   :  { %1169 = shalt.err (!%p1166_p7)
}
  0x14   :  { %s1292_s9 = smov 128   ;;  %s1293_s10 = smov 8  }
  0x15   :  { %40 = dma.hbm_to_vmem [thread:$0]  %s1532_s1, 256, %s35_s22, [#allocation6], %s1292_s9, %s1292_s9, %s1293_s10  }
  0x16   :  { %s1170_s15 = scalar_lea.hbm %s1531_s0, 4096 }
  0x17   :  { %p1171_p8 = scmp.ne.s32.totalorder %s1531_s0, %s1170_s15  ;;  %p1174_p9 = scmp.lt.u32.totalorder %s1170_s15, %s1531_s0 }
  0x19   :  { %p1176_p10 = pnand %p1174_p9, %p1171_p8 }
  0x1b   :  { %1179 = shalt.err (!%p1176_p10)
}
  0x1c   :  { %s1180_s20 = scalar_lea.vmem %s1336_s24, 4096  ;;  %p1185_p12 = scmp.lt.s32.totalorder %s1336_s24, %s1336_s24 }
  0x1d   :  { %p1181_p11 = scmp.ne.s32.totalorder %s1336_s24, %s1180_s20  ;;  %p1186_p13 = scmp.lt.s32.totalorder %s1180_s20, %s1180_s20 }
  0x1f   :  { %p1187_p0 = por %p1186_p13, %p1185_p12 }
  0x21   :  { %p1188_p1 = pnand %p1187_p0, %p1181_p11 }
  0x23   :  { %1191 = shalt.err (!%p1188_p1)
}
  0x24   :  { %28 = dma.hbm_to_vmem [thread:$0]  %s1531_s0, 4096, %s1336_s24, [#allocation3], %s1292_s9, %s1292_s9, %s1293_s10  }
  0x25   :  { %s1294_s22 = smov [#allocation7]   ;;  %s1295_s25 = smov [#allocation8]  }
  0x26   :  { %s46_s23 = sshll.u32 %s1294_s22, 4  ;;  %s58_s26 = sshll.u32 %s1295_s25, 4  ;;  %s47_s23 = int_to_ptr.vmem [resolvable:$true] %s46_s23  ;;  %s1373_s26 = int_to_ptr.vmem [resolvable:$true] %s58_s26 }
  0x27   :  { %s1192_s29 = scalar_lea.hbm %s1533_s2, 2048 }
  0x28   :  { %p1193_p2 = scmp.ne.s32.totalorder %s1533_s2, %s1192_s29  ;;  %p1196_p3 = scmp.lt.u32.totalorder %s1192_s29, %s1533_s2 }
  0x2a   :  { %p1198_p4 = pnand %p1196_p3, %p1193_p2 }
  0x2c   :  { %1201 = shalt.err (!%p1198_p4)
}
  0x2d   :  { %s1202_s0 = scalar_lea.vmem %s47_s23, 2048  ;;  %p1207_p6 = scmp.lt.s32.totalorder %s47_s23, %s47_s23 }
  0x2e   :  { %p1203_p5 = scmp.ne.s32.totalorder %s47_s23, %s1202_s0  ;;  %p1208_p7 = scmp.lt.s32.totalorder %s1202_s0, %s1202_s0 }
  0x30   :  { %p1209_p8 = por %p1208_p7, %p1207_p6 }
  0x32   :  { %p1210_p9 = pnand %p1209_p8, %p1203_p5 }
  0x34   :  { %1213 = shalt.err (!%p1210_p9)
}
  0x35   :  { %52 = dma.hbm_to_vmem [thread:$0]  %s1533_s2, 2048, %s47_s23, [#allocation6], %s1292_s9, %s1292_s9, %s1293_s10  }
  0x36   :  { %s1214_s15 = scalar_lea.hbm %s1534_s3, 2048 }
  0x37   :  { %p1215_p10 = scmp.ne.s32.totalorder %s1534_s3, %s1214_s15  ;;  %p1218_p11 = scmp.lt.u32.totalorder %s1214_s15, %s1534_s3 }
  0x39   :  { %p1220_p12 = pnand %p1218_p11, %p1215_p10 }
  0x3b   :  { %1223 = shalt.err (!%p1220_p12)
}
  0x3c   :  { %s1224_s20 = scalar_lea.vmem %s1373_s26, 2048  ;;  %p1229_p0 = scmp.lt.s32.totalorder %s1373_s26, %s1373_s26 }
  0x3d   :  { %p1225_p13 = scmp.ne.s32.totalorder %s1373_s26, %s1224_s20  ;;  %p1230_p1 = scmp.lt.s32.totalorder %s1224_s20, %s1224_s20 }
  0x3f   :  { %p1231_p2 = por %p1230_p1, %p1229_p0 }
  0x41   :  { %p1232_p3 = pnand %p1231_p2, %p1225_p13 }
  0x43   :  { %1235 = shalt.err (!%p1232_p3)
}
  0x44   :  { %64 = dma.hbm_to_vmem [thread:$0]  %s1534_s3, 2048, %s1373_s26, [#allocation9], %s1292_s9, %s1292_s9, %s1293_s10  }
  0x45   :  { %1280 = dma.done.wait [#allocation3], 4096  }
  0x46   :  { %1281 = vsyncadd [#allocation3], 4294963200 }
  0x47   :  { %1282 = dma.done.wait [#allocation6], 2304  }
  0x48   :  { %1283 = vsyncadd [#allocation6], 4294964992 }
  0x49   :  { %1284 = dma.done.wait [#allocation9], 2048  }
  0x4a   :  { %1285 = vsyncadd [#allocation9], 4294965248  ;;  %v1296_v0 = vmov 0.0|0.0   ;;  %vm1297_vm0 = vmmov 0   ;;  %v1298_v1 = vmov 0.0   ;;  %v79_v2 = vld [vmem:[#allocation2] sm:$0xff]  ;;  %v253_v52 = vlaneseq }
  0x4b   :  { %963 = vmatprep.subr.bf16.mxu0 %v1296_v0  ;;  %987 = vmatprep.subr.bf16.mxu1 %v1296_v0  ;;  %v80_v3 = vld [vmem:[#allocation2 + $0x8] sm:$0xff]  ;;  %v95_v4 = vld [vmem:[#allocation2 + $0x80] sm:$0xff]  ;;  %v81_v8 = vld [vmem:[#allocation2 + $0x10] sm:$0xff]  ;;  %s1299_s3 = smov [#allocation11]  }
  0x4c   :  { %785 = vmatprep.mubr.msk.f32.mxu0 %vm1297_vm0, %v1298_v1  ;;  %820 = vmatprep.mubr.msk.f32.mxu1 %vm1297_vm0, %v1298_v1  ;;  %v1416_v5 = vpack.c.bf16 %v80_v3, %v79_v2  ;;  %v96_v6 = vld [vmem:[#allocation2 + $0x88] sm:$0xff]  ;;  %v82_v9 = vld [vmem:[#allocation2 + $0x18] sm:$0xff]  ;;  %v97_v10 = vld [vmem:[#allocation2 + $0x90] sm:$0xff]  ;;  %v254_v53 = vand.u32 127, %v253_v52  ;;  %s630_s21 = sshll.u32 %s1299_s3, 4  ;;  %s631_s21 = int_to_ptr.vmem [resolvable:$true] %s630_s21 }
  0x4d   :  { %v1418_v7 = vpack.c.bf16 %v96_v6, %v95_v4  ;;  %v98_v11 = vld [vmem:[#allocation2 + $0x98] sm:$0xff]  ;;  %v1424_v12 = vpack.c.bf16 %v82_v9, %v81_v8  ;;  %v83_v14 = vld [vmem:[#allocation2 + $0x20] sm:$0xff]  ;;  %v84_v15 = vld [vmem:[#allocation2 + $0x28] sm:$0xff]  ;;  %s1236_s22 = scalar_lea.vmem %s631_s21, 256  ;;  %p1241_p5 = scmp.lt.s32.totalorder %s631_s21, %s631_s21 }
  0x4e   :  { %965 = vmatpush3.bf16.xpose.msra.mxu0 %v1416_v5  ;;  %v1426_v13 = vpack.c.bf16 %v98_v11, %v97_v10  ;;  %v99_v16 = vld [vmem:[#allocation2 + $0xa0] sm:$0xff]  ;;  %v100_v17 = vld [vmem:[#allocation2 + $0xa8] sm:$0xff]  ;;  %v1432_v18 = vpack.c.bf16 %v84_v15, %v83_v14  ;;  %v85_v20 = vld [vmem:[#allocation2 + $0x30] sm:$0xff]  ;;  %vm255_vm1 = vcmp.lt.s32.totalorder %v254_v53, 16  ;;  %p1237_p4 = scmp.ne.s32.totalorder %s631_s21, %s1236_s22  ;;  %p1242_p6 = scmp.lt.s32.totalorder %s1236_s22, %s1236_s22 }
  0x4f   :  { %989 = vmatpush3.bf16.xpose.msra.mxu1 %v1418_v7  ;;  %966 = vmatprep.subr.bf16.mxu0 %v1296_v0  ;;  %v1434_v19 = vpack.c.bf16 %v100_v17, %v99_v16  ;;  %v86_v21 = vld [vmem:[#allocation2 + $0x38] sm:$0xff]  ;;  %v101_v22 = vld [vmem:[#allocation2 + $0xb0] sm:$0xff]  ;;  %v87_v26 = vld [vmem:[#allocation2 + $0x40] sm:$0xff] }
  0x50   :  { %990 = vmatprep.subr.bf16.mxu1 %v1296_v0  ;;  %v102_v23 = vld [vmem:[#allocation2 + $0xb8] sm:$0xff]  ;;  %v973_v24 = vpack.c.bf16 %v86_v21, %v85_v20  ;;  %v88_v27 = vld [vmem:[#allocation2 + $0x48] sm:$0xff]  ;;  %v103_v28 = vld [vmem:[#allocation2 + $0xc0] sm:$0xff]  ;;  %p1243_p7 = por %p1242_p6, %p1241_p5 }
  0x51   :  { %v1440_v25 = vpack.c.bf16 %v102_v23, %v101_v22  ;;  %v104_v29 = vld [vmem:[#allocation2 + $0xc8] sm:$0xff]  ;;  %v976_v30 = vpack.c.bf16 %v88_v27, %v87_v26  ;;  %v89_v32 = vld [vmem:[#allocation2 + $0x50] sm:$0xff]  ;;  %v90_v33 = vld [vmem:[#allocation2 + $0x58] sm:$0xff] }
  0x52   :  { %v1445_v31 = vpack.c.bf16 %v104_v29, %v103_v28  ;;  %v105_v34 = vld [vmem:[#allocation2 + $0xd0] sm:$0xff]  ;;  %v106_v35 = vld [vmem:[#allocation2 + $0xd8] sm:$0xff]  ;;  %v979_v36 = vpack.c.bf16 %v90_v33, %v89_v32  ;;  %v91_v38 = vld [vmem:[#allocation2 + $0x60] sm:$0xff]  ;;  %p1244_p8 = pnand %p1243_p7, %p1237_p4 }
  0x53   :  { %v1450_v37 = vpack.c.bf16 %v106_v35, %v105_v34  ;;  %v92_v39 = vld [vmem:[#allocation2 + $0x68] sm:$0xff]  ;;  %v107_v40 = vld [vmem:[#allocation2 + $0xe0] sm:$0xff]  ;;  %v93_v44 = vld [vmem:[#allocation2 + $0x70] sm:$0xff] }
  0x54   :  { %v108_v41 = vld [vmem:[#allocation2 + $0xe8] sm:$0xff]  ;;  %v982_v42 = vpack.c.bf16 %v92_v39, %v91_v38  ;;  %v94_v45 = vld [vmem:[#allocation2 + $0x78] sm:$0xff]  ;;  %v109_v46 = vld [vmem:[#allocation2 + $0xf0] sm:$0xff] }
  0x55   :  { %v1455_v43 = vpack.c.bf16 %v108_v41, %v107_v40  ;;  %v110_v47 = vld [vmem:[#allocation2 + $0xf8] sm:$0xff]  ;;  %v985_v48 = vpack.c.bf16 %v94_v45, %v93_v44  ;;  %v111_v50 = vld [vmem:[#allocation5] sm:$0xff]  ;;  %v1464_v51 = vld [vmem:[#allocation5 + $0x8] sm:$0xff] }
  0x56   :  { %968 = vmatpush3.bf16.xpose.msra.mxu0 %v1424_v12  ;;  %v1460_v49 = vpack.c.bf16 %v110_v47, %v109_v46  ;;  %v434_v6 = vld [vmem:[#allocation8] sm:$0xff]  ;;  %v435_v8 = vld [vmem:[#allocation8 + $0x8] sm:$0xff]  ;;  %v436_v9 = vld [vmem:[#allocation8 + $0x10] sm:$0xff] }
  0x57   :  { %992 = vmatpush3.bf16.xpose.msra.mxu1 %v1426_v13  ;;  %969 = vmatprep.subr.bf16.mxu0 %v1296_v0  ;;  %v1059_v10 = vpack.c.bf16 %v435_v8, %v434_v6  ;;  %v437_v11 = vld [vmem:[#allocation8 + $0x18] sm:$0xff]  ;;  %v438_v14 = vld [vmem:[#allocation8 + $0x20] sm:$0xff]  ;;  %v439_v15 = vld [vmem:[#allocation8 + $0x28] sm:$0xff] }
  0x58   :  { %993 = vmatprep.subr.bf16.mxu1 %v1296_v0  ;;  %v1067_v16 = vpack.c.bf16 %v439_v15, %v438_v14  ;;  %v440_v17 = vld [vmem:[#allocation8 + $0x30] sm:$0xff]  ;;  %v442_v21 = vld [vmem:[#allocation8 + $0x40] sm:$0xff]  ;;  %v443_v22 = vld [vmem:[#allocation8 + $0x48] sm:$0xff] }
  0x59   :  { %v1075_v23 = vpack.c.bf16 %v443_v22, %v442_v21  ;;  %v445_v26 = vld [vmem:[#allocation8 + $0x58] sm:$0xff]  ;;  %v446_v28 = vld [vmem:[#allocation8 + $0x60] sm:$0xff]  ;;  %v447_v29 = vld [vmem:[#allocation8 + $0x68] sm:$0xff] }
  0x5a   :  { %v448_v32 = vld [vmem:[#allocation8 + $0x70] sm:$0xff]  ;;  %v449_v33 = vld [vmem:[#allocation8 + $0x78] sm:$0xff]  ;;  %v423_v44 = vld [vmem:[#allocation7 + $0x28] sm:$0xff] }
  0x5b   :  { %v1087_v34 = vpack.c.bf16 %v449_v33, %v448_v32  ;;  %v424_v45 = vld [vmem:[#allocation7 + $0x30] sm:$0xff]  ;;  %v425_v46 = vld [vmem:[#allocation7 + $0x38] sm:$0xff]  ;;  %v427_v47 = vld [vmem:[#allocation7 + $0x48] sm:$0xff] }
  0x5c   :  { %v430_v52 = vld [vmem:[#allocation7 + $0x60] sm:$0xff]  ;;  %v431_v53 = vld [vmem:[#allocation7 + $0x68] sm:$0xff] }
  0x5e   :  { %971 = vmatpush3.bf16.xpose.msra.mxu0 %v1432_v18 }
  0x5f   :  { %995 = vmatpush3.bf16.xpose.msra.mxu1 %v1434_v19  ;;  %972 = vmatprep.subr.bf16.mxu0 %v1296_v0 }
  0x60   :  { %996 = vmatprep.subr.bf16.mxu1 %v1296_v0 }
  0x66   :  { %974 = vmatpush3.bf16.xpose.msra.mxu0 %v973_v24 }
  0x67   :  { %998 = vmatpush3.bf16.xpose.msra.mxu1 %v1440_v25  ;;  %975 = vmatprep.subr.bf16.mxu0 %v1296_v0 }
  0x68   :  { %999 = vmatprep.subr.bf16.mxu1 %v1296_v0 }
  0x6e   :  { %977 = vmatpush3.bf16.xpose.msra.mxu0 %v976_v30 }
  0x6f   :  { %1001 = vmatpush3.bf16.xpose.msra.mxu1 %v1445_v31  ;;  %978 = vmatprep.subr.bf16.mxu0 %v1296_v0 }
  0x70   :  { %1002 = vmatprep.subr.bf16.mxu1 %v1296_v0 }
  0x76   :  { %980 = vmatpush3.bf16.xpose.msra.mxu0 %v979_v36 }
  0x77   :  { %1004 = vmatpush3.bf16.xpose.msra.mxu1 %v1450_v37  ;;  %981 = vmatprep.subr.bf16.mxu0 %v1296_v0 }
  0x78   :  { %1005 = vmatprep.subr.bf16.mxu1 %v1296_v0 }
  0x7e   :  { %983 = vmatpush3.bf16.xpose.msra.mxu0 %v982_v42 }
  0x7f   :  { %1007 = vmatpush3.bf16.xpose.msra.mxu1 %v1455_v43  ;;  %984 = vmatprep.subr.bf16.mxu0 %v1296_v0 }
  0x80   :  { %1008 = vmatprep.subr.bf16.mxu1 %v1296_v0 }
  0x86   :  { %986 = vmatpush3.bf16.xpose.msra.mxu0 %v985_v48 }
  0x87   :  { %1010 = vmatpush3.bf16.xpose.msra.mxu1 %v1460_v49  ;;  %1060 = vmatprep.subr.bf16.mxu0 %v1059_v10 }
  0x88   :  { %1011 = vmatprep.subr.bf16.mxu1 %v1296_v0 }
  0x8d   :  { %786 = vmatmul.mubr.f32.vlgmr.msra.gmra.mrb[0].mxu0 %v111_v50 }
  0x8e   :  { %821 = vmatmul.mubr.f32.vlgmr.msra.gmra.mrb[0].mxu1 %v1464_v51  ;;  %925 = vmatprep.mubr.f32.mxu0 %v111_v50  ;;  %v429_v50 = vld [vmem:[#allocation7 + $0x58] sm:$0xff] }
  0x8f   :  { %1013 = vmatpush3.bf16.msra.mxu1 %v1416_v5  ;;  %855 = vmatprep.mubr.msk.f32.mxu1 %vm1297_vm0, %v1298_v1 }
  0x90   :  { %1014 = vmatprep.subr.bf16.mxu1 %v1296_v0  ;;  %1062 = vmatpush3.bf16.msra.mxu0 %v1059_v10 }
  0x93   :  { %1016 = vmatpush3.bf16.msra.mxu1 %v1424_v12  ;;  %v1063_v12 = vpack.c.bf16 %v437_v11, %v436_v9 }
  0x94   :  { %1017 = vmatprep.subr.bf16.mxu1 %v1296_v0 }
  0x95   :  { %1064 = vmatprep.subr.bf16.mxu0 %v1063_v12 }
  0x96   :  { %1066 = vmatpush3.bf16.msra.mxu0 %v1063_v12 }
  0x97   :  { %1019 = vmatpush3.bf16.msra.mxu1 %v1432_v18  ;;  %v441_v18 = vld [vmem:[#allocation8 + $0x38] sm:$0xff]  ;;  %1068 = vmatprep.subr.bf16.mxu0 %v1067_v16 }
  0x98   :  { %1020 = vmatprep.subr.bf16.mxu1 %v1296_v0  ;;  %v1071_v20 = vpack.c.bf16 %v441_v18, %v440_v17 }
  0x9a   :  { %1070 = vmatpush3.bf16.msra.mxu0 %v1067_v16 }
  0x9b   :  { %1022 = vmatpush3.bf16.msra.mxu1 %v973_v24  ;;  %1072 = vmatprep.subr.bf16.mxu0 %v1071_v20  ;;  %v444_v24 = vld [vmem:[#allocation8 + $0x50] sm:$0xff] }
  0x9c   :  { %1023 = vmatprep.subr.bf16.mxu1 %v1296_v0  ;;  %v1079_v27 = vpack.c.bf16 %v445_v26, %v444_v24 }
  0x9e   :  { %1074 = vmatpush3.bf16.msra.mxu0 %v1071_v20 }
  0x9f   :  { %1025 = vmatpush3.bf16.msra.mxu1 %v976_v30  ;;  %1076 = vmatprep.subr.bf16.mxu0 %v1075_v23  ;;  %v1083_v30 = vpack.c.bf16 %v447_v29, %v446_v28 }
  0xa0   :  { %1026 = vmatprep.subr.bf16.mxu1 %v1296_v0 }
  0xa2   :  { %1078 = vmatpush3.bf16.msra.mxu0 %v1075_v23 }
  0xa3   :  { %1028 = vmatpush3.bf16.msra.mxu1 %v979_v36  ;;  %1080 = vmatprep.subr.bf16.mxu0 %v1079_v27 }
  0xa4   :  { %1029 = vmatprep.subr.bf16.mxu1 %v1296_v0 }
  0xa6   :  { %1082 = vmatpush3.bf16.msra.mxu0 %v1079_v27 }
  0xa7   :  { %1031 = vmatpush3.bf16.msra.mxu1 %v982_v42  ;;  %1084 = vmatprep.subr.bf16.mxu0 %v1083_v30 }
  0xa8   :  { %1032 = vmatprep.subr.bf16.mxu1 %v1296_v0 }
  0xaa   :  { %1086 = vmatpush3.bf16.msra.mxu0 %v1083_v30 }
  0xab   :  { %1034 = vmatpush3.bf16.msra.mxu1 %v985_v48  ;;  %1088 = vmatprep.subr.bf16.mxu0 %v1087_v34 }
  0xac   :  { %1035 = vmatprep.subr.bf16.mxu1 %v1296_v0 }
  0xae   :  { %1090 = vmatpush3.bf16.msra.mxu0 %v1087_v34 }
  0xb1   :  { %926 = vmatmul.mubr.f32.vlgmr.msra.gmra.mrb[2].mxu0 %v1464_v51 }
 0x160   :  { %v179_v54 = vpop.f32.mrb[0].mxu0 }
 0x161   :  { %v787_v55 = vpop.f32.mrb[1].mxu0  ;;  %v256_v56 = vsel %vm255_vm1, %v179_v54, -1e+30  ;;  %v249_v57 = vpop.f32.mrb[0].mxu1  ;;  %v1115_v54 = vpack.c.bf16 %v431_v53, %v430_v52 }
 0x162   :  { %258 = vmax.xlane.f32.xlu0 %v256_v56  ;;  %v822_v58 = vpop.f32.mrb[1].mxu1  ;;  %v257_v59 = vsel %vm255_vm1, %v249_v57, -1e+30  ;;  %v432_v55 = vld [vmem:[#allocation7 + $0x70] sm:$0xff] }
 0x166   :  { %260 = vmax.xlane.f32.xlu0 %v257_v59 }
 0x1ef   :  { %v259_v60 = vpop.xlane.xlu0 %258 }
 0x1f0   :  { %v262_v61 = vsub.f32 %v256_v56, %v259_v60  ;;  %v433_v56 = vld [vmem:[#allocation7 + $0x78] sm:$0xff] }
 0x1f1   :  { %v1119_v57 = vpack.c.bf16 %v433_v56, %v432_v55 }
 0x1f2   :  { %v264_v62 = vmul.f32 1.442695, %v262_v61 }
 0x1f3   :  { %v261_v63 = vpop.xlane.xlu0 %260 }
 0x1f4   :  { %1136 = vpow2.f32 %v264_v62  ;;  %v263_v2 = vsub.f32 %v257_v59, %v261_v63 }
 0x1f6   :  { %v266_v3 = vmul.f32 1.442695, %v263_v2 }
 0x1f8   :  { %1138 = vpow2.f32 %v266_v3 }
 0x1fe   :  { %v1137_v4 = vpop.eup %1136 }
 0x1ff   :  { %268 = vadd.xlane.f32.xlu1 %v1137_v4 }
 0x202   :  { %v1139_v5 = vpop.eup %1138 }
 0x203   :  { %270 = vadd.xlane.f32.xlu1 %v1139_v5 }
 0x28c   :  { %v269_v35 = vpop.xlane.xlu1 %268 }
 0x28d   :  { %1140 = vrcp.f32 %v269_v35 }
 0x290   :  { %v271_v36 = vpop.xlane.xlu1 %270 }
 0x291   :  { %1142 = vrcp.f32 %v271_v36 }
 0x297   :  { %v1141_v38 = vpop.eup %1140 }
 0x298   :  { %v274_v39 = vmul.f32 %v1141_v38, %v1137_v4 }
 0x29a   :  { %856 = vmatmul.mubr.f32.vlgmr.msra.gmra.mrb[2].mxu1 %v274_v39  ;;  %276 = vst [vmem:[#allocation11] sm:$0xff] %v274_v39 }
 0x29b   :  { %v1143_v40 = vpop.eup %1142  ;;  %1037 = vmatpush3.bf16.msra.mxu1 %v1418_v7  ;;  %890 = vmatprep.mubr.msk.f32.mxu1 %vm1297_vm0, %v1298_v1  ;;  %v418_v1 = vld [vmem:[#allocation7] sm:$0xff]  ;;  %v419_v7 = vld [vmem:[#allocation7 + $0x8] sm:$0xff] }
 0x29c   :  { %1038 = vmatprep.subr.bf16.mxu1 %v1296_v0  ;;  %v275_v41 = vmul.f32 %v1143_v40, %v1139_v5 }
 0x29e   :  { %277 = vst [vmem:[#allocation11 + $0x8] sm:$0xff] %v275_v41 }
 0x29f   :  { %1040 = vmatpush3.bf16.msra.mxu1 %v1426_v13  ;;  %v1091_v13 = vpack.c.bf16 %v419_v7, %v418_v1 }
 0x2a0   :  { %1041 = vmatprep.subr.bf16.mxu1 %v1296_v0 }
 0x2a1   :  { %1092 = vmatprep.subr.bf16.mxu0 %v1091_v13 }
 0x2a2   :  { %1094 = vmatpush3.bf16.msra.mxu0 %v1091_v13 }
 0x2a3   :  { %1043 = vmatpush3.bf16.msra.mxu1 %v1434_v19  ;;  %v420_v19 = vld [vmem:[#allocation7 + $0x10] sm:$0xff] }
 0x2a4   :  { %1044 = vmatprep.subr.bf16.mxu1 %v1296_v0 }
 0x2a7   :  { %1046 = vmatpush3.bf16.msra.mxu1 %v1440_v25  ;;  %v421_v25 = vld [vmem:[#allocation7 + $0x18] sm:$0xff] }
 0x2a8   :  { %1047 = vmatprep.subr.bf16.mxu1 %v1296_v0  ;;  %v1095_v42 = vpack.c.bf16 %v421_v25, %v420_v19 }
 0x2aa   :  { %1096 = vmatprep.subr.bf16.mxu0 %v1095_v42 }
 0x2ab   :  { %1049 = vmatpush3.bf16.msra.mxu1 %v1445_v31  ;;  %v422_v31 = vld [vmem:[#allocation7 + $0x20] sm:$0xff]  ;;  %1098 = vmatpush3.bf16.msra.mxu0 %v1095_v42 }
 0x2ac   :  { %1050 = vmatprep.subr.bf16.mxu1 %v1296_v0 }
 0x2af   :  { %1052 = vmatpush3.bf16.msra.mxu1 %v1450_v37  ;;  %v1099_v37 = vpack.c.bf16 %v423_v44, %v422_v31 }
 0x2b0   :  { %1053 = vmatprep.subr.bf16.mxu1 %v1296_v0 }
 0x2b1   :  { %1100 = vmatprep.subr.bf16.mxu0 %v1099_v37 }
 0x2b2   :  { %1102 = vmatpush3.bf16.msra.mxu0 %v1099_v37 }
 0x2b3   :  { %1055 = vmatpush3.bf16.msra.mxu1 %v1455_v43  ;;  %v426_v43 = vld [vmem:[#allocation7 + $0x40] sm:$0xff] }
 0x2b4   :  { %1056 = vmatprep.subr.bf16.mxu1 %v1296_v0  ;;  %v1103_v0 = vpack.c.bf16 %v425_v46, %v424_v45  ;;  %v1107_v48 = vpack.c.bf16 %v427_v47, %v426_v43 }
 0x2b6   :  { %1104 = vmatprep.subr.bf16.mxu0 %v1103_v0 }
 0x2b7   :  { %1058 = vmatpush3.bf16.msra.mxu1 %v1460_v49  ;;  %v428_v49 = vld [vmem:[#allocation7 + $0x50] sm:$0xff]  ;;  %1106 = vmatpush3.bf16.msra.mxu0 %v1103_v0 }
 0x2b8   :  { %1108 = vmatprep.subr.bf16.mxu0 %v1107_v48  ;;  %v1111_v51 = vpack.c.bf16 %v429_v50, %v428_v49 }
 0x2ba   :  { %891 = vmatmul.mubr.f32.vlgmr.msra.gmra.mrb[4].mxu1 %v275_v41 }
 0x2bb   :  { %1110 = vmatpush3.bf16.msra.mxu0 %v1107_v48 }
 0x2bc   :  { %1112 = vmatprep.subr.bf16.mxu0 %v1111_v51 }
 0x2bf   :  { %1114 = vmatpush3.bf16.msra.mxu0 %v1111_v51 }
 0x2c0   :  { %1116 = vmatprep.subr.bf16.mxu0 %v1115_v54 }
 0x2c3   :  { %1118 = vmatpush3.bf16.msra.mxu0 %v1115_v54 }
 0x2c4   :  { %1120 = vmatprep.subr.bf16.mxu0 %v1119_v57 }
 0x2c7   :  { %1122 = vmatpush3.bf16.msra.mxu0 %v1119_v57 }
 0x36d   :  { %v344_v58 = vpop.f32.mrb[2].mxu1 }
 0x36e   :  { %v857_v59 = vpop.f32.mrb[3].mxu1  ;;  %960 = vmatprep.mubr.f32.mxu0 %v344_v58 }
 0x38d   :  { %v414_v60 = vpop.f32.mrb[4].mxu1 }
 0x38e   :  { %v892_v61 = vpop.f32.mrb[5].mxu1  ;;  %961 = vmatmul.mubr.f32.vlgmr.msra.gmra.mrb[2].mxu0 %v414_v60 }
 0x38f   :  { %1247 = shalt.err (!%p1244_p8)
}
 0x390   :  { %s1248_s26 = scalar_lea.hbm %s1537_s6, 256 }
 0x391   :  { %p1249_p9 = scmp.ne.s32.totalorder %s1537_s6, %s1248_s26  ;;  %p1252_p10 = scmp.lt.u32.totalorder %s1248_s26, %s1537_s6 }
 0x393   :  { %p1254_p11 = pnand %p1252_p10, %p1249_p9 }
 0x395   :  { %1257 = shalt.err (!%p1254_p11)
}
 0x396   :  { %636 = dma.vmem_to_hbm [thread:$0]  %s631_s21, 256, %s1537_s6, [#allocation12], %s1292_s9, %s1292_s9, %s1293_s10  }
 0x397   :  { %v648_v62 = vld [vmem:[%s1535_s4] ss:$0 sm:$0xff]  ;;  %s1300_s24 = smov [#allocation10]  }
 0x398   :  { %s618_s12 = sshll.u32 %s1300_s24, 4  ;;  %s619_s12 = int_to_ptr.vmem [resolvable:$true] %s618_s12 }
 0x399   :  { %s1258_s13 = scalar_lea.vmem %s619_s12, 256  ;;  %p1263_p13 = scmp.lt.s32.totalorder %s619_s12, %s619_s12 }
 0x39a   :  { %p1259_p12 = scmp.ne.s32.totalorder %s619_s12, %s1258_s13  ;;  %p1264_p0 = scmp.lt.s32.totalorder %s1258_s13, %s1258_s13 }
 0x39c   :  { %p1265_p1 = por %p1264_p0, %p1263_p13 }
 0x39e   :  { %p1266_p2 = pnand %p1265_p1, %p1259_p12 }
 0x461   :  { %v962_v63 = vpop.f32.mrb[2].mxu0 }
 0x462   :  { %v608_v2 = vadd.f32 %v962_v63, %v648_v62  ;;  %v591_v3 = vpop.f32.mrb[3].mxu0 }
 0x463   :  { %v607_v4 = vadd.f32 %v648_v62, %v591_v3 }
 0x464   :  { %1144 = vtanh.f32 %v608_v2 }
 0x465   :  { %1146 = vtanh.f32 %v607_v4 }
 0x46e   :  { %v1145_v5 = vpop.eup %1144 }
 0x46f   :  { %v1147_v6 = vpop.eup %1146  ;;  %612 = vst [vmem:[#allocation10 + $0x8] sm:$0xff] %v1145_v5 }
 0x470   :  { %611 = vst [vmem:[#allocation10] sm:$0xff] %v1147_v6 }
 0x471   :  { %1269 = shalt.err (!%p1266_p2)
}
 0x472   :  { %s1270_s14 = scalar_lea.hbm %s1536_s5, 256 }
 0x473   :  { %p1271_p3 = scmp.ne.s32.totalorder %s1536_s5, %s1270_s14  ;;  %p1274_p4 = scmp.lt.u32.totalorder %s1270_s14, %s1536_s5 }
 0x475   :  { %p1276_p5 = pnand %p1274_p4, %p1271_p3 }
 0x477   :  { %1279 = shalt.err (!%p1276_p5)
}
 0x478   :  { %624 = dma.vmem_to_hbm [thread:$0]  %s619_s12, 256, %s1536_s5, [#allocation4], %s1292_s9, %s1292_s9, %s1293_s10  }
 0x479   :  { %1286 = dma.done.wait [#allocation4], 256  }
 0x47a   :  { %1287 = vsyncadd [#allocation4], 4294967040 }
 0x47b   :  { %1288 = dma.done.wait [#allocation12], 256  }
 0x47c   :  { %1289 = vsyncadd [#allocation12], 4294967040 }
 0x47d   :  { %643 = vsyncpa [#allocation3], 1 }
 0x47e   :  { %644 = vsyncpa [#allocation6], 1 }
 0x47f   :  { %645 = vsyncpa [#allocation9], 1 }
 0x480   :  { %646 = vsyncpa [#allocation4], 1 }
 0x481   :  { %647 = vsyncpa [#allocation12], 1 }

</bundles_post_ra>
